<compile_context>
chip_gen: v5e
topology: v5e:2x2
jax: 0.10.0
libtpu: 0.0.40
codegen_flags: <defaults>
</compile_context>

<pallas_src>
import math

import jax
import jax.numpy as jnp
from jax.experimental import pallas as pl
from jax.experimental.pallas import tpu as pltpu

_LANE = 128
_SUBLANE = 8
_TARGET_BLOCK_BYTES = 4 << 20   # ~4 MiB per operand per block
_VMEM_LIMIT_BYTES = 32 << 20    # explicit so double-buffered blocks fit v5e too


def _drop_path_kernel(scale_ref, x_ref, o_ref):
    """out = x * scale  (per-row scale, lane-broadcast).

    scale_ref : VMEM (tile_m, 1)    float32, values in {0, 1/keep_prob}
    x_ref     : VMEM (tile_m, 128)  activation tile (any float dtype)
    o_ref     : VMEM (tile_m, 128)
    """
    o_ref[...] = (x_ref[...].astype(jnp.float32) * scale_ref[...]).astype(o_ref.dtype)


def segformer_drop_path(x, drop_prob, *, training, key,
                        block_bytes=_TARGET_BLOCK_BYTES):
    """Matches HF SegformerDropPath.forward semantics.

    Inference / drop_prob == 0 -> identity.
    Training                   -> per-sample keep mask; surviving samples are
                                  rescaled by 1 / keep_prob.
    drop_prob / training must be Python scalars (module hyperparams).
    """
    if drop_prob is None or float(drop_prob) == 0.0 or not training:
        return x

    keep_prob = 1.0 - float(drop_prob)
    B = x.shape[0]
    orig_shape = x.shape
    N = math.prod(x.shape[1:]) if x.ndim > 1 else 1

    # Per-sample scale in float32: floor(keep_prob + U[0,1)) / keep_prob.
    rand = jax.random.uniform(key, (B,), dtype=jnp.float32)
    scale = jnp.floor(keep_prob + rand) / keep_prob            # (B,), {0, 1/kp}

    itemsize = jnp.dtype(x.dtype).itemsize

    # ---- lane-dense (total_rows, 128) view, batch collapsed into rows ----
    if N % _LANE == 0:
        rows_per_sample = N // _LANE
        x2 = x.reshape(B * rows_per_sample, _LANE)             # free reshape
        padded = False
    else:
        # Rare fallback: per-sample payload not lane aligned -> pad each sample
        # to a whole number of 128-lane rows (one extra activation round trip).
        rows_per_sample = pl.cdiv(N, _LANE)
        n_pad = rows_per_sample * _LANE
        x2 = jnp.pad(x.reshape(B, N), ((0, 0), (0, n_pad - N)))
        x2 = x2.reshape(B * rows_per_sample, _LANE)
        padded = True

    total_rows = B * rows_per_sample
    scale_rows = jnp.repeat(scale, rows_per_sample)[:, None]   # (total_rows, 1)

    # ---- block sizing: ~block_bytes per operand, row count a multiple of 8 ----
    target_rows = max(
        _SUBLANE,
        ((block_bytes // (_LANE * itemsize)) // _SUBLANE) * _SUBLANE,
    )
    if total_rows <= target_rows:
        tile_m = total_rows      # single full-extent block (always legal)
    else:
        tile_m = target_rows     # multiple of 8; ragged tail handled by the
                                 # partial last grid block (idempotent writes)
    num_tiles = pl.cdiv(total_rows, tile_m)

    out2 = pl.pallas_call(
        _drop_path_kernel,
        out_shape=jax.ShapeDtypeStruct((total_rows, _LANE), x.dtype),
        grid=(num_tiles,),
        in_specs=[
            pl.BlockSpec((tile_m, 1), lambda m: (m, 0)),        # per-row scale
            pl.BlockSpec((tile_m, _LANE), lambda m: (m, 0)),    # activations
        ],
        out_specs=pl.BlockSpec((tile_m, _LANE), lambda m: (m, 0)),
        compiler_params=pltpu.CompilerParams(
            dimension_semantics=("parallel",),
            vmem_limit_bytes=_VMEM_LIMIT_BYTES,
        ),
        cost_estimate=pl.CostEstimate(
            flops=total_rows * _LANE,
            transcendentals=0,
            bytes_accessed=2 * total_rows * _LANE * itemsize + total_rows * 4,
        ),
    )(scale_rows, x2)

    if padded:
        out = out2.reshape(B, rows_per_sample * _LANE)[:, :N]
        return out.reshape(orig_shape)
    return out2.reshape(orig_shape)


class SegformerDropPath:
    """JAX/Pallas port of the PyTorch SegformerDropPath module."""

    def __init__(self, drop_prob=None):
        self.drop_prob = drop_prob
        self.training = True

    def __call__(self, hidden_states, *, key, block_bytes=_TARGET_BLOCK_BYTES):
        return segformer_drop_path(
            hidden_states, self.drop_prob, training=self.training, key=key,
            block_bytes=block_bytes,
        )


def _reference_drop_path(x, drop_prob, key):
    keep_prob = 1.0 - drop_prob
    rand = jax.random.uniform(key, (x.shape[0],), dtype=jnp.float32)
    mask = jnp.floor(keep_prob + rand)
    bshape = (x.shape[0],) + (1,) * (x.ndim - 1)
    out = x.astype(jnp.float32) / keep_prob * mask.reshape(bshape)
    return out.astype(x.dtype)


if __name__ == "__main__":
    key = jax.random.PRNGKey(0)
    k_x, k_x2, k_x3, k_x4, k_drop = jax.random.split(key, 5)

    drop_prob = 0.3
    module = SegformerDropPath(drop_prob)
    module.training = True

    # --- main check: (B, S, H) transformer activations, lane-aligned fast path
    B, S, H = 2, 8, 32
    x = jax.random.normal(k_x, (B, S, H), dtype=jnp.float32)
    out = jax.block_until_ready(module(x, key=k_drop))
    ref = _reference_drop_path(x, drop_prob, k_drop)
    assert out.shape == x.shape and out.dtype == x.dtype
    assert jnp.allclose(out, ref, rtol=1e-6, atol=1e-6), "mismatch vs reference (B,S,H)"

    # --- multi-tile check with a tiny block target: exercises the flat grid,
    #     blocks that span multiple samples, and the partial last block.
    x_m = jax.random.normal(k_x3, (3, 40, 128), dtype=jnp.float32)  # 120 rows
    out_m = jax.block_until_ready(module(x_m, key=k_drop, block_bytes=8192))
    ref_m = _reference_drop_path(x_m, drop_prob, k_drop)
    assert jnp.allclose(out_m, ref_m, rtol=1e-6, atol=1e-6), "mismatch (multi-tile)"

    # --- ragged check: per-sample size not a multiple of 128 (padding fallback)
    x_r = jax.random.normal(k_x2, (2, 7, 30), dtype=jnp.float32)
    out_r = jax.block_until_ready(module(x_r, key=k_drop))
    ref_r = _reference_drop_path(x_r, drop_prob, k_drop)
    assert jnp.allclose(out_r, ref_r, rtol=1e-6, atol=1e-6), "mismatch vs reference (ragged)"

    # --- bf16 check: scale stays f32, only the product is cast back
    x_b = jax.random.normal(k_x4, (2, 8, 64), dtype=jnp.float32).astype(jnp.bfloat16)
    out_b = jax.block_until_ready(module(x_b, key=k_drop))
    ref_b = _reference_drop_path(x_b, drop_prob, k_drop)
    assert out_b.dtype == jnp.bfloat16
    assert jnp.allclose(out_b.astype(jnp.float32), ref_b.astype(jnp.float32),
                        rtol=5e-2, atol=5e-2), "mismatch vs reference (bf16)"

    # --- eval mode (or drop_prob=0) must be the identity
    module.training = False
    out_eval = jax.block_until_ready(module(x, key=k_drop))
    assert jnp.array_equal(out_eval, x)

    print("KERNEL_OK")
</pallas_src>

<mosaic_0001>
module attributes {stable_mosaic.version = 11 : i64} {
  func.func @_drop_path_kernel(%arg0: i32, %arg1: memref<4x1xf32, #tpu.memory_space<vmem>>, %arg2: memref<4x128xf32, #tpu.memory_space<vmem>>, %arg3: memref<4x128xf32, #tpu.memory_space<vmem>>) attributes {dimension_semantics = [#tpu.dimension_semantics<parallel>], iteration_bounds = array<i64: 1>, scalar_prefetch = 0 : i64, scratch_operands = 0 : i64, tpu.core_type = #tpu.core_type<tc>, window_params = [{transform_indices = @transform_0, window_bounds = array<i64: 4, 1>}, {transform_indices = @transform_1, window_bounds = array<i64: 4, 128>}, {transform_indices = @transform_2, window_bounds = array<i64: 4, 128>}]} {
    %c0 = arith.constant 0 : index
    %c0_0 = arith.constant 0 : index
    %0 = vector.load %arg2[%c0, %c0_0] : memref<4x128xf32, #tpu.memory_space<vmem>>, vector<4x128xf32>
    %c0_1 = arith.constant 0 : index
    %c0_2 = arith.constant 0 : index
    %1 = vector.load %arg1[%c0_1, %c0_2] : memref<4x1xf32, #tpu.memory_space<vmem>>, vector<4x1xf32>
    %2 = vector.broadcast %1 : vector<4x1xf32> to vector<4x128xf32>
    %3 = arith.mulf %0, %2 : vector<4x128xf32>
    %c0_3 = arith.constant 0 : index
    %c0_4 = arith.constant 0 : index
    %4 = vector.load %arg3[%c0_3, %c0_4] : memref<4x128xf32, #tpu.memory_space<vmem>>, vector<4x128xf32>
    tpu.vector_store %arg3[%c0_3, %c0_4], %3 {strides = array<i32>} : memref<4x128xf32, #tpu.memory_space<vmem>>, vector<4x128xf32>,
    return
  }
  func.func @transform_0(%arg0: i32) -> (i32, i32) {
    %c0_i32 = arith.constant 0 : i32
    %c0_i32_0 = arith.constant 0 : i32
    return %arg0, %c0_i32 : i32, i32
  }
  func.func @transform_1(%arg0: i32) -> (i32, i32) {
    %c0_i32 = arith.constant 0 : i32
    %c0_i32_0 = arith.constant 0 : i32
    return %arg0, %c0_i32 : i32, i32
  }
  func.func @transform_2(%arg0: i32) -> (i32, i32) {
    %c0_i32 = arith.constant 0 : i32
    %c0_i32_0 = arith.constant 0 : i32
    return %arg0, %c0_i32 : i32, i32
  }
}

</mosaic_0001>

<bundles_post_ra>
// kernel: tpu_custom_call.1
= control target key start
LH: loop header
LB: loop body
LE: loop exit
PB: predicated region body
PF: predicated region fallthrough
CT: control target
= control target key end

     0   :  { %s92_s0 = inlined_call_operand.vmem [shape: f32[4,1], index: 0, kind: input, shape index: {}]   ;;  %s93_s1 = inlined_call_operand.vmem [shape: f32[4,128], index: 1, kind: input, shape index: {}]   ;;  %s94_s2 = inlined_call_operand.hbm [shape: f32[4,128], index: 2, kind: output, shape index: {}]  }
   0x1   :  { %v13_v0 = vld [vmem:[%s92_s0] sm:$0xf] }
   0x2   :  { %7 = vsyncpa [#allocation3], 0  ;;  %v66_v1 = vmov 0   ;;  %v12_v2 = vld [vmem:[%s93_s1] sm:$0xf]  ;;  %s67_s13 = smov [#allocation2]  }
   0x3   :  { %39 = vset.pattern.permute.xlu0 %v66_v1  ;;  %s26_s14 = sshll.u32 %s67_s13, 4  ;;  %s28_s17 = sshll.u32 %s94_s2, 4  ;;  %s27_s14 = int_to_ptr.vmem [resolvable:$true] %s26_s14  ;;  %s29_s17 = int_to_ptr.hbm [resolvable:$true] %s28_s17 }
   0x4   :  { %16 = vperm.xlu0 %39, %v13_v0  }
  0x76   :  { %v17_v3 = vpop.permute.xlu0 %16 }
  0x77   :  { %v19_v4 = vmul.f32 %v17_v3, %v12_v2 }
  0x79   :  { %20 = vst [vmem:[#allocation2] sm:$0xf] %v19_v4 }
  0x7a   :  { %31 = dma.vmem_to_hbm [thread:$0]  %s27_s14, 64, %s29_s17, [#allocation3]  }
  0x7b   :  { %64 = dma.done.wait [#allocation3], 64  }
  0x7c   :  { %65 = vsyncadd [#allocation3], 4294967232 }
  0x7d   :  { %36 = vsyncpa [#allocation3], 1 }

</bundles_post_ra>
